<compile_context>
chip_gen: v7x
topology: tpu7x:2x2x1
jax: 0.10.0
libtpu: 0.0.40
codegen_flags: <defaults>
</compile_context>

<pallas_src>
import functools

import jax
import jax.numpy as jnp
from jax.experimental import pallas as pl
from jax.experimental.pallas import tpu as pltpu

EPS = 1e-5
_MIB = 1024 * 1024


def _layernorm_kernel(x_ref, scale_ref, shift_ref, o_ref):
    """Plain path: one logical row per block row; reduce over the lane axis."""
    x = x_ref[...].astype(jnp.float32)                    # (tile_rows, emb)
    mean = jnp.mean(x, axis=-1, keepdims=True)
    centered = x - mean
    var = jnp.mean(centered * centered, axis=-1, keepdims=True)  # unbiased=False
    inv_std = jax.lax.rsqrt(var + EPS)                    # EUP rsqrt
    scale = scale_ref[...].astype(jnp.float32)            # (1, emb)
    shift = shift_ref[...].astype(jnp.float32)            # (1, emb)
    o_ref[...] = (scale * (centered * inv_std) + shift).astype(o_ref.dtype)


def _layernorm_packed_kernel(x_ref, scale_ref, shift_ref, o_ref, *, emb_dim):
    """Lane-packed path: k = 128 // emb_dim logical rows folded into the lane
    axis. Segmented per-row reductions are done with a block-diagonal 0/1
    matrix on the MXU (hi/lo bf16 split keeps ~f32 accuracy)."""
    x = x_ref[...].astype(jnp.float32)                    # (tile_rows, lanes)
    lanes = x.shape[-1]
    # emb_dim is a power of two here (divisor of 128) -> use shifts, not div.
    shift_amt = emb_dim.bit_length() - 1
    li = jax.lax.broadcasted_iota(jnp.int32, (lanes, lanes), 0) >> shift_amt
    lj = jax.lax.broadcasted_iota(jnp.int32, (lanes, lanes), 1) >> shift_amt
    seg = jnp.where(li == lj, 1.0, 0.0).astype(jnp.bfloat16)   # exact 0/1 blocks

    def segsum(v):
        # Accurate segmented sum: bf16 MXU matmul with hi/lo operand split.
        v_hi = v.astype(jnp.bfloat16)
        v_lo = (v - v_hi.astype(jnp.float32)).astype(jnp.bfloat16)
        return (jnp.dot(v_hi, seg, preferred_element_type=jnp.float32)
                + jnp.dot(v_lo, seg, preferred_element_type=jnp.float32))

    inv_n = jnp.float32(1.0 / emb_dim)
    mean = segsum(x) * inv_n                               # broadcast per segment
    centered = x - mean
    var = segsum(centered * centered) * inv_n
    inv_std = jax.lax.rsqrt(var + EPS)                     # EUP rsqrt
    scale = scale_ref[...].astype(jnp.float32)             # (1, lanes), pre-tiled
    shift = shift_ref[...].astype(jnp.float32)
    o_ref[...] = (scale * (centered * inv_std) + shift).astype(o_ref.dtype)


def _round_up(n, m):
    return ((n + m - 1) // m) * m


def _vmem_capacity_bytes():
    try:
        info = pltpu.get_tpu_info()
        cap = getattr(info, "vmem_capacity_bytes", None)
        if cap:
            return int(cap)
    except Exception:
        pass
    return 64 * _MIB  # conservative default (v7x)


def _launch(kernel_fn, x2, scale2, shift2):
    rows, width = x2.shape
    dtype_bytes = jnp.dtype(x2.dtype).itemsize
    row_align = 8 if dtype_bytes >= 4 else 16              # sublane packing

    vmem_cap = _vmem_capacity_bytes()
    vmem_limit = min(vmem_cap * 3 // 4, 96 * _MIB)         # 48 MiB v7x, 96 MiB v5e/v6e
    ws_budget = max(8 * _MIB, vmem_limit - 8 * _MIB)       # headroom for compiler
    target_block_bytes = 4 * _MIB if vmem_cap <= 64 * _MIB else 8 * _MIB

    # Per-row bytes: 1 buffered copy of one row (I/O target) vs. working set
    # (2x double-buffered input + 2x output + ~6 f32 temporaries).
    row_io_bytes = width * dtype_bytes
    per_row_ws = width * (4 * dtype_bytes + 6 * 4)

    tile_rows = min(
        max(row_align, target_block_bytes // row_io_bytes),
        max(row_align, ws_budget // per_row_ws),
        _round_up(rows, row_align),
    )
    tile_rows = max(row_align, (tile_rows // row_align) * row_align)

    # v7x megacore: ensure >= 2 grid steps so both TensorCores get work.
    if pl.cdiv(rows, tile_rows) == 1 and rows > 2 * row_align:
        tile_rows = max(row_align, _round_up(pl.cdiv(rows, 2), row_align))

    grid = pl.cdiv(rows, tile_rows)  # partial last block handled (masked) by Pallas

    return pl.pallas_call(
        kernel_fn,
        out_shape=jax.ShapeDtypeStruct((rows, width), x2.dtype),
        grid_spec=pltpu.PrefetchScalarGridSpec(
            num_scalar_prefetch=0,
            grid=(grid,),
            in_specs=[
                pl.BlockSpec((tile_rows, width), lambda i: (i, 0)),
                pl.BlockSpec((1, width), lambda i: (0, 0)),
                pl.BlockSpec((1, width), lambda i: (0, 0)),
            ],
            out_specs=pl.BlockSpec((tile_rows, width), lambda i: (i, 0)),
        ),
        compiler_params=pltpu.CompilerParams(
            dimension_semantics=("parallel",),
            vmem_limit_bytes=vmem_limit,
        ),
    )(x2, scale2, shift2)


def layer_norm(x, scale, shift):
    """x: [..., emb_dim]; scale/shift: [emb_dim]. Returns same shape/dtype as x."""
    orig_shape = x.shape
    emb_dim = orig_shape[-1]
    x2 = x.reshape(-1, emb_dim)
    rows = x2.shape[0]

    # Lane-packing fast path: narrow feature dim that divides 128.
    if emb_dim < 128 and 128 % emb_dim == 0:
        k = 128 // emb_dim
        if rows >= k and rows % k == 0:
            xp = x2.reshape(rows // k, k * emb_dim)        # free (contiguous) reshape
            scale_p = jnp.tile(scale.reshape(-1), k).reshape(1, k * emb_dim)
            shift_p = jnp.tile(shift.reshape(-1), k).reshape(1, k * emb_dim)
            kernel_fn = functools.partial(_layernorm_packed_kernel, emb_dim=emb_dim)
            out = _launch(kernel_fn, xp, scale_p, shift_p)
            return out.reshape(orig_shape)

    out = _launch(_layernorm_kernel, x2,
                  scale.reshape(1, emb_dim), shift.reshape(1, emb_dim))
    return out.reshape(orig_shape)


def layer_norm_ref(x, scale, shift):
    xf = x.astype(jnp.float32)
    mean = jnp.mean(xf, axis=-1, keepdims=True)
    var = jnp.mean((xf - mean) ** 2, axis=-1, keepdims=True)
    norm = (xf - mean) / jnp.sqrt(var + EPS)
    return (scale * norm + shift).astype(x.dtype)


if __name__ == "__main__":
    key = jax.random.PRNGKey(0)
    k1, k2 = jax.random.split(key)

    # Case 1: module's small config (emb_dim=32 < 128 -> lane-packed path).
    batch, seq, emb_dim = 2, 8, 32
    x = jax.random.normal(k1, (batch, seq, emb_dim), dtype=jnp.float32)
    scale = jnp.ones((emb_dim,), dtype=jnp.float32)    # nn.Parameter(ones)
    shift = jnp.zeros((emb_dim,), dtype=jnp.float32)   # nn.Parameter(zeros)
    out = jax.block_until_ready(layer_norm(x, scale, shift))
    ref = layer_norm_ref(x, scale, shift)
    assert out.shape == x.shape and out.dtype == x.dtype
    assert jnp.allclose(out, ref, atol=5e-5, rtol=5e-5)

    # Case 2: lane-dense width (emb_dim=128 -> plain path).
    emb_dim2 = 128
    x2 = jax.random.normal(k2, (batch, seq, emb_dim2), dtype=jnp.float32)
    scale2 = jnp.ones((emb_dim2,), dtype=jnp.float32)
    shift2 = jnp.zeros((emb_dim2,), dtype=jnp.float32)
    out2 = jax.block_until_ready(layer_norm(x2, scale2, shift2))
    ref2 = layer_norm_ref(x2, scale2, shift2)
    assert out2.shape == x2.shape and out2.dtype == x2.dtype
    assert jnp.allclose(out2, ref2, atol=1e-5, rtol=1e-5)

    print("KERNEL_OK")
</pallas_src>

<mosaic_0001>
module attributes {stable_mosaic.version = 11 : i64} {
  func.func @_layernorm_packed_kernel(%arg0: i32, %arg1: memref<8x128xf32, #tpu.memory_space<vmem>>, %arg2: memref<1x128xf32, #tpu.memory_space<vmem>>, %arg3: memref<1x128xf32, #tpu.memory_space<vmem>>, %arg4: memref<8x128xf32, #tpu.memory_space<vmem>>) attributes {dimension_semantics = [#tpu.dimension_semantics<parallel>], iteration_bounds = array<i64: 1>, scalar_prefetch = 0 : i64, scratch_operands = 0 : i64, tpu.core_type = #tpu.core_type<tc>, window_params = [{transform_indices = @transform_0, window_bounds = array<i64: 8, 128>}, {pipeline_mode = #tpu.pipeline_mode<synchronous>, transform_indices = @transform_1, window_bounds = array<i64: 1, 128>}, {pipeline_mode = #tpu.pipeline_mode<synchronous>, transform_indices = @transform_2, window_bounds = array<i64: 1, 128>}, {transform_indices = @transform_3, window_bounds = array<i64: 8, 128>}]} {
    %c0 = arith.constant 0 : index
    %c0_0 = arith.constant 0 : index
    %0 = vector.load %arg1[%c0, %c0_0] : memref<8x128xf32, #tpu.memory_space<vmem>>, vector<8x128xf32>
    %1 = tpu.iota {dimensions = array<i32: 0>} : vector<128x128xi32>
    %c5_i32 = arith.constant 5 : i32
    %2 = vector.broadcast %c5_i32 : i32 to vector<128x128xi32>
    %3 = arith.shrsi %1, %2 : vector<128x128xi32>
    %4 = tpu.iota {dimensions = array<i32: 1>} : vector<128x128xi32>
    %c5_i32_1 = arith.constant 5 : i32
    %5 = vector.broadcast %c5_i32_1 : i32 to vector<128x128xi32>
    %6 = arith.shrsi %4, %5 : vector<128x128xi32>
    %7 = arith.cmpi eq, %3, %6 : vector<128x128xi32>
    %cst = arith.constant 1.000000e+00 : f32
    %cst_2 = arith.constant 0.000000e+00 : f32
    %8 = vector.broadcast %cst : f32 to vector<128x128xf32>
    %9 = vector.broadcast %cst_2 : f32 to vector<128x128xf32>
    %10 = arith.select %7, %8, %9 : vector<128x128xi1>, vector<128x128xf32>
    %11 = arith.truncf %10 : vector<128x128xf32> to vector<128x128xbf16>
    %12 = arith.truncf %0 : vector<8x128xf32> to vector<8x128xbf16>
    %13 = arith.extf %12 : vector<8x128xbf16> to vector<8x128xf32>
    %14 = arith.subf %0, %13 : vector<8x128xf32>
    %15 = arith.truncf %14 : vector<8x128xf32> to vector<8x128xbf16>
    %cst_3 = arith.constant dense<0.000000e+00> : vector<8x128xf32>
    %16 = tpu.matmul %12, %11, %cst_3 {dimension_numbers = #tpu.dot_dimension_numbers<[1], [0], [0], [1], [0, 0, 1, 1], [], []>} : vector<8x128xbf16>, vector<128x128xbf16>, vector<8x128xf32> -> vector<8x128xf32>
    %cst_4 = arith.constant dense<0.000000e+00> : vector<8x128xf32>
    %17 = tpu.matmul %15, %11, %cst_4 {dimension_numbers = #tpu.dot_dimension_numbers<[1], [0], [0], [1], [0, 0, 1, 1], [], []>} : vector<8x128xbf16>, vector<128x128xbf16>, vector<8x128xf32> -> vector<8x128xf32>
    %18 = arith.addf %16, %17 : vector<8x128xf32>
    %cst_5 = arith.constant 3.125000e-02 : f32
    %19 = vector.broadcast %cst_5 : f32 to vector<8x128xf32>
    %20 = arith.mulf %18, %19 : vector<8x128xf32>
    %21 = arith.subf %0, %20 : vector<8x128xf32>
    %22 = arith.mulf %21, %21 : vector<8x128xf32>
    %23 = arith.truncf %22 : vector<8x128xf32> to vector<8x128xbf16>
    %24 = arith.extf %23 : vector<8x128xbf16> to vector<8x128xf32>
    %25 = arith.subf %22, %24 : vector<8x128xf32>
    %26 = arith.truncf %25 : vector<8x128xf32> to vector<8x128xbf16>
    %cst_6 = arith.constant dense<0.000000e+00> : vector<8x128xf32>
    %27 = tpu.matmul %23, %11, %cst_6 {dimension_numbers = #tpu.dot_dimension_numbers<[1], [0], [0], [1], [0, 0, 1, 1], [], []>} : vector<8x128xbf16>, vector<128x128xbf16>, vector<8x128xf32> -> vector<8x128xf32>
    %cst_7 = arith.constant dense<0.000000e+00> : vector<8x128xf32>
    %28 = tpu.matmul %26, %11, %cst_7 {dimension_numbers = #tpu.dot_dimension_numbers<[1], [0], [0], [1], [0, 0, 1, 1], [], []>} : vector<8x128xbf16>, vector<128x128xbf16>, vector<8x128xf32> -> vector<8x128xf32>
    %29 = arith.addf %27, %28 : vector<8x128xf32>
    %cst_8 = arith.constant 3.125000e-02 : f32
    %30 = vector.broadcast %cst_8 : f32 to vector<8x128xf32>
    %31 = arith.mulf %29, %30 : vector<8x128xf32>
    %cst_9 = arith.constant 9.99999974E-6 : f32
    %32 = vector.broadcast %cst_9 : f32 to vector<8x128xf32>
    %33 = arith.addf %31, %32 : vector<8x128xf32>
    %34 = math.rsqrt %33 : vector<8x128xf32>
    %c0_10 = arith.constant 0 : index
    %c0_11 = arith.constant 0 : index
    %35 = vector.load %arg2[%c0_10, %c0_11] : memref<1x128xf32, #tpu.memory_space<vmem>>, vector<1x128xf32>
    %c0_12 = arith.constant 0 : index
    %c0_13 = arith.constant 0 : index
    %36 = vector.load %arg3[%c0_12, %c0_13] : memref<1x128xf32, #tpu.memory_space<vmem>>, vector<1x128xf32>
    %37 = arith.mulf %21, %34 : vector<8x128xf32>
    %38 = vector.broadcast %35 : vector<1x128xf32> to vector<8x128xf32>
    %39 = arith.mulf %38, %37 : vector<8x128xf32>
    %40 = vector.broadcast %36 : vector<1x128xf32> to vector<8x128xf32>
    %41 = arith.addf %39, %40 : vector<8x128xf32>
    %c0_14 = arith.constant 0 : index
    %c0_15 = arith.constant 0 : index
    %42 = vector.load %arg4[%c0_14, %c0_15] : memref<8x128xf32, #tpu.memory_space<vmem>>, vector<8x128xf32>
    tpu.vector_store %arg4[%c0_14, %c0_15], %41 {strides = array<i32>} : memref<8x128xf32, #tpu.memory_space<vmem>>, vector<8x128xf32>,
    return
  }
  func.func @transform_0(%arg0: i32) -> (i32, i32) {
    %c0_i32 = arith.constant 0 : i32
    %c0_i32_0 = arith.constant 0 : i32
    return %arg0, %c0_i32 : i32, i32
  }
  func.func @transform_1(%arg0: i32) -> (i32, i32) {
    %c0_i32 = arith.constant 0 : i32
    %c0_i32_0 = arith.constant 0 : i32
    %c0_i32_1 = arith.constant 0 : i32
    return %c0_i32, %c0_i32_0 : i32, i32
  }
  func.func @transform_2(%arg0: i32) -> (i32, i32) {
    %c0_i32 = arith.constant 0 : i32
    %c0_i32_0 = arith.constant 0 : i32
    %c0_i32_1 = arith.constant 0 : i32
    return %c0_i32, %c0_i32_0 : i32, i32
  }
  func.func @transform_3(%arg0: i32) -> (i32, i32) {
    %c0_i32 = arith.constant 0 : i32
    %c0_i32_0 = arith.constant 0 : i32
    return %arg0, %c0_i32 : i32, i32
  }
}

</mosaic_0001>

<bundles_post_ra>
// kernel: tpu_custom_call.1
= control target key start
LH: loop header
LB: loop body
LE: loop exit
PB: predicated region body
PF: predicated region fallthrough
CT: control target
= control target key end

     0   :  { %8 = vsyncpa [#allocation3], 0  ;;  %s812_s0 = inlined_call_operand.hbm [shape: f32[4,128], index: 0, kind: input, shape index: {}]   ;;  %s813_s1 = inlined_call_operand.vmem [shape: f32[1,128], index: 1, kind: input, shape index: {}]   ;;  %s814_s2 = inlined_call_operand.vmem [shape: f32[1,128], index: 2, kind: input, shape index: {}]   ;;  %s815_s3 = inlined_call_operand.hbm [shape: f32[4,128], index: 3, kind: output, shape index: {}]  }
   0x1   :  { %9 = vsyncpa [#allocation4], 0 }
   0x2   :  { %14 = vsyncadd [#allocation3], 64  ;;  %s563_s12 = smov [#allocation2]   ;;  %s515_s16 = scalar_lea.hbm %s812_s0, 64 }
   0x3   :  { %s15_s13 = sshll.u32 %s563_s12, 4  ;;  %p516_p0 = scmp.ne.s32.totalorder %s812_s0, %s515_s16  ;;  %s16_s13 = int_to_ptr.vmem [resolvable:$true] %s15_s13 }
   0x4   :  { %p519_p1 = scmp.lt.u32.totalorder %s515_s16, %s812_s0 }
   0x6   :  { %p521_p2 = pnand %p519_p1, %p516_p0 }
   0x8   :  { %524 = shalt.err (!%p521_p2)
}
   0x9   :  { %s525_s21 = scalar_lea.vmem %s16_s13, 64  ;;  %s529_s22 = scalar_lea.vmem %s16_s13, 128 }
   0xa   :  { %p526_p3 = scmp.ne.s32.totalorder %s16_s13, %s525_s21  ;;  %p530_p4 = scmp.lt.s32.totalorder %s16_s13, %s16_s13 }
   0xb   :  { %p531_p5 = scmp.lt.s32.totalorder %s529_s22, %s525_s21 }
   0xd   :  { %p532_p6 = por %p531_p5, %p530_p4 }
   0xf   :  { %p533_p7 = pnand %p532_p6, %p526_p3 }
  0x11   :  { %536 = shalt.err (!%p533_p7)
}
  0x12   :  { %s564_s23 = smov 64   ;;  %s565_s24 = smov 4   ;;  %v31_v0 = vlaneseq }
  0x13   :  { %21 = dma.hbm_to_vmem [thread:$0]  %s812_s0, 64, %s16_s13, [#allocation3], %s564_s23, %s564_s23, %s565_s24  }
  0x14   :  { %559 = dma.done.wait [#allocation3], 128  }
  0x15   :  { %560 = vsyncadd [#allocation3], 4294967168  ;;  %v566_v1 = vmov 0.0   ;;  %vm567_vm0 = vmmov 0   ;;  %v32_v2 = vshrl.u32 %v31_v0, 7  ;;  %v65_v3 = vand.u32 127, %v31_v0 }
  0x16   :  { %418 = vmatprep.subr.bf16.mxu0 %v566_v1  ;;  %434 = vmatprep.mubr.msk.bf16.mxu0 %vm567_vm0, %v566_v1  ;;  %v568_v19 = vmov 1.0|1.0   ;;  %v30_v35 = vld [vmem:[#allocation2] sm:$0xff] }
  0x17   :  { %458 = vmatprep.subr.bf16.mxu1 %v566_v1  ;;  %474 = vmatprep.mubr.msk.bf16.mxu1 %vm567_vm0, %v566_v1  ;;  %v33_v4 = vadd.s32 8, %v32_v2  ;;  %v48_v5 = vshra.s32 %v32_v2, 5  ;;  %v611_v6 = vshra.s32 %v65_v3, 5  ;;  %v34_v7 = vadd.s32 16, %v32_v2 }
  0x18   :  { %v35_v8 = vadd.s32 24, %v32_v2  ;;  %v36_v9 = vadd.s32 32, %v32_v2  ;;  %v37_v10 = vadd.s32 40, %v32_v2  ;;  %v38_v14 = vadd.s32 48, %v32_v2 }
  0x19   :  { %v49_v11 = vshra.s32 %v33_v4, 5  ;;  %vm67_vm1 = vcmp.eq.s32.totalorder %v48_v5, %v611_v6  ;;  %v50_v12 = vshra.s32 %v34_v7, 5  ;;  %v39_v15 = vadd.s32 56, %v32_v2  ;;  %v380_v5 = vld [vmem:[%s813_s1] ss:$0 sm:$0xff] }
  0x1a   :  { %v51_v13 = vshra.s32 %v35_v8, 5  ;;  %v52_v16 = vshra.s32 %v36_v9, 5  ;;  %v53_v17 = vshra.s32 %v37_v10, 5  ;;  %v54_v21 = vshra.s32 %v38_v14, 5 }
  0x1b   :  { %vm68_vm2 = vcmp.eq.s32.totalorder %v49_v11, %v611_v6  ;;  %vm69_vm3 = vcmp.eq.s32.totalorder %v50_v12, %v611_v6  ;;  %v55_v22 = vshra.s32 %v39_v15, 5  ;;  %v40_v23 = vadd.s32 64, %v32_v2 }
  0x1c   :  { %vm616_vm4 = vmpackc.low %vm68_vm2, %vm67_vm1  ;;  %vm70_vm5 = vcmp.eq.s32.totalorder %v51_v13, %v611_v6  ;;  %vm71_vm7 = vcmp.eq.s32.totalorder %v52_v16, %v611_v6  ;;  %vm72_vm8 = vcmp.eq.s32.totalorder %v53_v17, %v611_v6  ;;  %v41_v24 = vadd.s32 72, %v32_v2 }
  0x1d   :  { %419 = vmatpush3.bf16.msk.msra.mxu0 %vm616_vm4, %v568_v19  ;;  %459 = vmatpush3.bf16.msk.msra.mxu1 %vm616_vm4, %v568_v19  ;;  %vm628_vm6 = vmpackc.low %vm70_vm5, %vm69_vm3  ;;  %vm73_vm10 = vcmp.eq.s32.totalorder %v54_v21, %v611_v6  ;;  %vm74_vm11 = vcmp.eq.s32.totalorder %v55_v22, %v611_v6  ;;  %v56_v26 = vshra.s32 %v40_v23, 5  ;;  %v42_v28 = vadd.s32 80, %v32_v2 }
  0x1e   :  { %420 = vmatprep.subr.bf16.mxu0 %v566_v1  ;;  %460 = vmatprep.subr.bf16.mxu1 %v566_v1  ;;  %vm642_vm9 = vmpackc.low %vm72_vm8, %vm71_vm7  ;;  %v57_v27 = vshra.s32 %v41_v24, 5  ;;  %v43_v29 = vadd.s32 88, %v32_v2  ;;  %v44_v31 = vadd.s32 96, %v32_v2  ;;  %v45_v32 = vadd.s32 104, %v32_v2 }
  0x1f   :  { %vm656_vm12 = vmpackc.low %vm74_vm11, %vm73_vm10  ;;  %vm75_vm13 = vcmp.eq.s32.totalorder %v56_v26, %v611_v6  ;;  %v58_v33 = vshra.s32 %v42_v28, 5  ;;  %v46_v37 = vadd.s32 112, %v32_v2  ;;  %v47_v38 = vadd.s32 120, %v32_v2 }
  0x20   :  { %vm76_vm14 = vcmp.eq.s32.totalorder %v57_v27, %v611_v6  ;;  %v59_v34 = vshra.s32 %v43_v29, 5  ;;  %v60_v39 = vshra.s32 %v44_v31, 5  ;;  %v61_v40 = vshra.s32 %v45_v32, 5 }
  0x21   :  { %421 = vmatpush3.bf16.msk.msra.mxu0 %vm628_vm6, %v568_v19  ;;  %461 = vmatpush3.bf16.msk.msra.mxu1 %vm628_vm6, %v568_v19  ;;  %vm670_vm15 = vmpackc.low %vm76_vm14, %vm75_vm13  ;;  %vm77_vm1 = vcmp.eq.s32.totalorder %v58_v33, %v611_v6  ;;  %v107_v41 = vpack.c.bf16 %v30_v35, %v30_v35  ;;  %v62_v43 = vshra.s32 %v46_v37, 5  ;;  %v63_v44 = vshra.s32 %v47_v38, 5 }
  0x22   :  { %422 = vmatprep.subr.bf16.mxu0 %v566_v1  ;;  %462 = vmatprep.subr.bf16.mxu1 %v566_v1  ;;  %vm78_vm2 = vcmp.eq.s32.totalorder %v59_v34, %v611_v6  ;;  %vm79_vm5 = vcmp.eq.s32.totalorder %v60_v39, %v611_v6  ;;  %vm80_vm7 = vcmp.eq.s32.totalorder %v61_v40, %v611_v6 }
  0x23   :  { %vm684_vm3 = vmpackc.low %vm78_vm2, %vm77_vm1  ;;  %v108_v45 = vunpack.c.l.bf16 %v107_v41  ;;  %vm81_vm10 = vcmp.eq.s32.totalorder %v62_v43, %v611_v6  ;;  %vm82_vm11 = vcmp.eq.s32.totalorder %v63_v44, %v611_v6 }
  0x24   :  { %vm698_vm8 = vmpackc.low %vm80_vm7, %vm79_vm5 }
  0x25   :  { %423 = vmatpush3.bf16.msk.msra.mxu0 %vm642_vm9, %v568_v19  ;;  %463 = vmatpush3.bf16.msk.msra.mxu1 %vm642_vm9, %v568_v19  ;;  %v109_v47 = vsub.f32 %v30_v35, %v108_v45  ;;  %vm712_vm13 = vmpackc.low %vm82_vm11, %vm81_vm10 }
  0x26   :  { %424 = vmatprep.subr.bf16.mxu0 %v566_v1  ;;  %464 = vmatprep.subr.bf16.mxu1 %v566_v1 }
  0x27   :  { %v110_v49 = vpack.c.bf16 %v109_v47, %v109_v47 }
  0x29   :  { %425 = vmatpush3.bf16.msk.msra.mxu0 %vm656_vm12, %v568_v19  ;;  %465 = vmatpush3.bf16.msk.msra.mxu1 %vm656_vm12, %v568_v19 }
  0x2a   :  { %426 = vmatprep.subr.bf16.mxu0 %v566_v1  ;;  %466 = vmatprep.subr.bf16.mxu1 %v566_v1 }
  0x2d   :  { %427 = vmatpush3.bf16.msk.msra.mxu0 %vm670_vm15, %v568_v19  ;;  %467 = vmatpush3.bf16.msk.msra.mxu1 %vm670_vm15, %v568_v19 }
  0x2e   :  { %428 = vmatprep.subr.bf16.mxu0 %v566_v1  ;;  %468 = vmatprep.subr.bf16.mxu1 %v566_v1 }
  0x31   :  { %429 = vmatpush3.bf16.msk.msra.mxu0 %vm684_vm3, %v568_v19  ;;  %469 = vmatpush3.bf16.msk.msra.mxu1 %vm684_vm3, %v568_v19 }
  0x32   :  { %430 = vmatprep.subr.bf16.mxu0 %v566_v1  ;;  %470 = vmatprep.subr.bf16.mxu1 %v566_v1 }
  0x35   :  { %431 = vmatpush3.bf16.msk.msra.mxu0 %vm698_vm8, %v568_v19  ;;  %471 = vmatpush3.bf16.msk.msra.mxu1 %vm698_vm8, %v568_v19 }
  0x36   :  { %432 = vmatprep.subr.bf16.mxu0 %v566_v1  ;;  %472 = vmatprep.subr.bf16.mxu1 %v566_v1 }
  0x39   :  { %433 = vmatpush3.bf16.msk.msra.mxu0 %vm712_vm13, %v568_v19  ;;  %473 = vmatpush3.bf16.msk.msra.mxu1 %vm712_vm13, %v568_v19 }
  0x3a   :  { %438 = vmatprep.subr.bf16.mxu0 %v566_v1  ;;  %478 = vmatprep.subr.bf16.mxu1 %v566_v1 }
  0x3c   :  { %435 = vmatmul.mubr.bf16.vlgmr.msra.gmra.mrb[0].mxu0 %v110_v49 }
  0x3d   :  { %439 = vmatpush3.bf16.msk.msra.mxu0 %vm616_vm4, %v568_v19  ;;  %454 = vmatprep.mubr.msk.bf16.mxu0 %vm567_vm0, %v566_v1 }
  0x3e   :  { %440 = vmatprep.subr.bf16.mxu0 %v566_v1 }
  0x41   :  { %441 = vmatpush3.bf16.msk.msra.mxu0 %vm628_vm6, %v568_v19 }
  0x42   :  { %442 = vmatprep.subr.bf16.mxu0 %v566_v1 }
  0x45   :  { %443 = vmatpush3.bf16.msk.msra.mxu0 %vm642_vm9, %v568_v19 }
  0x46   :  { %444 = vmatprep.subr.bf16.mxu0 %v566_v1 }
  0x49   :  { %445 = vmatpush3.bf16.msk.msra.mxu0 %vm656_vm12, %v568_v19 }
  0x4a   :  { %446 = vmatprep.subr.bf16.mxu0 %v566_v1 }
  0x4d   :  { %447 = vmatpush3.bf16.msk.msra.mxu0 %vm670_vm15, %v568_v19 }
  0x4e   :  { %448 = vmatprep.subr.bf16.mxu0 %v566_v1 }
  0x51   :  { %449 = vmatpush3.bf16.msk.msra.mxu0 %vm684_vm3, %v568_v19 }
  0x52   :  { %450 = vmatprep.subr.bf16.mxu0 %v566_v1 }
  0x55   :  { %451 = vmatpush3.bf16.msk.msra.mxu0 %vm698_vm8, %v568_v19 }
  0x56   :  { %452 = vmatprep.subr.bf16.mxu0 %v566_v1 }
  0x59   :  { %453 = vmatpush3.bf16.msk.msra.mxu0 %vm712_vm13, %v568_v19 }
  0x5c   :  { %455 = vmatmul.mubr.bf16.vlgmr.msra.gmra.mrb[0].mxu0 %v107_v41 }
 0x12f   :  { %v185_v50 = vpop.f32.mrb[0].mxu0 }
 0x130   :  { %v191_v51 = vmul.f32 0.03125, %v185_v50  ;;  %v456_v52 = vpop.f32.mrb[1].mxu0 }
 0x131   :  { %v188_v53 = vpop.f32.mrb[2].mxu0 }
 0x132   :  { %v192_v54 = vsub.f32 %v30_v35, %v191_v51  ;;  %v457_v55 = vpop.f32.mrb[3].mxu0 }
 0x134   :  { %v193_v56 = vmul.f32 %v192_v54, %v192_v54 }
 0x136   :  { %v194_v57 = vpack.c.bf16 %v193_v56, %v193_v56 }
 0x138   :  { %v195_v58 = vunpack.c.l.bf16 %v194_v57 }
 0x13a   :  { %v196_v59 = vsub.f32 %v193_v56, %v195_v58 }
 0x13c   :  { %v197_v60 = vpack.c.bf16 %v196_v59, %v196_v59 }
 0x13e   :  { %475 = vmatmul.mubr.bf16.vlgmr.msra.gmra.mrb[0].mxu1 %v197_v60 }
 0x13f   :  { %479 = vmatpush3.bf16.msk.msra.mxu1 %vm616_vm4, %v568_v19  ;;  %494 = vmatprep.mubr.msk.bf16.mxu1 %vm567_vm0, %v566_v1 }
 0x140   :  { %480 = vmatprep.subr.bf16.mxu1 %v566_v1 }
 0x143   :  { %481 = vmatpush3.bf16.msk.msra.mxu1 %vm628_vm6, %v568_v19 }
 0x144   :  { %482 = vmatprep.subr.bf16.mxu1 %v566_v1 }
 0x147   :  { %483 = vmatpush3.bf16.msk.msra.mxu1 %vm642_vm9, %v568_v19 }
 0x148   :  { %484 = vmatprep.subr.bf16.mxu1 %v566_v1 }
 0x14b   :  { %485 = vmatpush3.bf16.msk.msra.mxu1 %vm656_vm12, %v568_v19 }
 0x14c   :  { %486 = vmatprep.subr.bf16.mxu1 %v566_v1 }
 0x14f   :  { %487 = vmatpush3.bf16.msk.msra.mxu1 %vm670_vm15, %v568_v19 }
 0x150   :  { %488 = vmatprep.subr.bf16.mxu1 %v566_v1 }
 0x153   :  { %489 = vmatpush3.bf16.msk.msra.mxu1 %vm684_vm3, %v568_v19 }
 0x154   :  { %490 = vmatprep.subr.bf16.mxu1 %v566_v1 }
 0x157   :  { %491 = vmatpush3.bf16.msk.msra.mxu1 %vm698_vm8, %v568_v19 }
 0x158   :  { %492 = vmatprep.subr.bf16.mxu1 %v566_v1  ;;  %v381_v1 = vld [vmem:[%s814_s2] ss:$0 sm:$0xff] }
 0x15b   :  { %493 = vmatpush3.bf16.msk.msra.mxu1 %vm712_vm13, %v568_v19 }
 0x15e   :  { %495 = vmatmul.mubr.bf16.vlgmr.msra.gmra.mrb[0].mxu1 %v194_v57 }
 0x231   :  { %v272_v61 = vpop.f32.mrb[0].mxu1 }
 0x232   :  { %v278_v62 = vmul.f32 0.03125, %v272_v61  ;;  %v496_v63 = vpop.f32.mrb[1].mxu1 }
 0x233   :  { %v275_v0 = vpop.f32.mrb[2].mxu1 }
 0x234   :  { %v279_v2 = vadd.f32 1e-05, %v278_v62  ;;  %v497_v3 = vpop.f32.mrb[3].mxu1 }
 0x236   :  { %513 = vrsqrt.f32 %v279_v2 }
 0x240   :  { %v514_v4 = vpop.eup %513 }
 0x241   :  { %v283_v6 = vmul.f32 %v514_v4, %v192_v54 }
 0x243   :  { %v290_v7 = vmul.f32 %v380_v5, %v283_v6 }
 0x245   :  { %v297_v8 = vadd.f32 %v381_v1, %v290_v7 }
 0x247   :  { %298 = vst [vmem:[#allocation5] sm:$0xff] %v297_v8 }
 0x248   :  { %303 = vsyncadd [#allocation4], 64  ;;  %s569_s30 = smov [#allocation5]  }
 0x249   :  { %s304_s4 = sshll.u32 %s569_s30, 4  ;;  %s305_s4 = int_to_ptr.vmem [resolvable:$true] %s304_s4 }
 0x24a   :  { %s537_s5 = scalar_lea.vmem %s305_s4, 64  ;;  %s541_s6 = scalar_lea.vmem %s305_s4, 128 }
 0x24b   :  { %p538_p8 = scmp.ne.s32.totalorder %s305_s4, %s537_s5  ;;  %p542_p9 = scmp.lt.s32.totalorder %s305_s4, %s305_s4 }
 0x24c   :  { %p543_p10 = scmp.lt.s32.totalorder %s541_s6, %s537_s5 }
 0x24e   :  { %p544_p11 = por %p543_p10, %p542_p9 }
 0x250   :  { %p545_p12 = pnand %p544_p11, %p538_p8 }
 0x252   :  { %548 = shalt.err (!%p545_p12)
}
 0x253   :  { %s549_s8 = scalar_lea.hbm %s815_s3, 64 }
 0x254   :  { %p550_p13 = scmp.ne.s32.totalorder %s815_s3, %s549_s8  ;;  %p553_p0 = scmp.lt.u32.totalorder %s549_s8, %s815_s3 }
 0x256   :  { %p555_p1 = pnand %p553_p0, %p550_p13 }
 0x258   :  { %558 = shalt.err (!%p555_p1)
}
 0x259   :  { %310 = dma.vmem_to_hbm [thread:$0]  %s305_s4, 64, %s815_s3, [#allocation4], %s564_s23, %s564_s23, %s565_s24  }
 0x25a   :  { %561 = dma.done.wait [#allocation4], 128  }
 0x25b   :  { %562 = vsyncadd [#allocation4], 4294967168 }
 0x25c   :  { %314 = vsyncpa [#allocation3], 1 }
 0x25d   :  { %315 = vsyncpa [#allocation4], 1 }

</bundles_post_ra>
